<compile_context>
chip_gen: v5e
topology: v5e:2x2
jax: 0.10.0
libtpu: 0.0.40
codegen_flags: <defaults>
</compile_context>

<pallas_src>
import jax
import jax.numpy as jnp
from jax.experimental import pallas as pl
from jax.experimental.pallas import tpu as pltpu


# ----------------------------- helpers ---------------------------------------


def _layernorm(x, gamma, beta, eps=1e-5):
    mu = jnp.mean(x, axis=-1, keepdims=True)
    var = jnp.mean((x - mu) ** 2, axis=-1, keepdims=True)
    return (x - mu) * jax.lax.rsqrt(var + eps) * gamma + beta


def _vmem_limit_bytes(requested):
    """Generation-aware VMEM cap: stay below physical capacity with headroom."""
    try:
        cap = int(pltpu.get_tpu_info().vmem_capacity_bytes)
    except Exception:
        cap = 64 * 1024 * 1024            # conservative (v7x-sized) fallback
    return int(min(max(requested, 16 * 1024 * 1024), cap - 12 * 1024 * 1024))


# --------------------------- body (layers) kernel ------------------------------


def make_body_kernel(cfg):
    E, ff = cfg["E"], cfg["ff"]
    n_heads, hd = cfg["n_heads"], cfg["head_dim"]
    n_layers = cfg["n_layers"]
    scale = 1.0 / (hd ** 0.5)
    bf16 = jnp.bfloat16

    def mm(a, b):
        # bf16 MXU inputs, f32 accumulation
        return jnp.dot(a.astype(bf16), b, preferred_element_type=jnp.float32)

    def ln(x, g, b, eps=1e-5):
        mu = jnp.mean(x, axis=-1, keepdims=True)
        var = jnp.mean((x - mu) ** 2, axis=-1, keepdims=True)
        return (x - mu) * jax.lax.rsqrt(var + eps) * g + b

    def softmax_rows(s):
        s = s - jnp.max(s, axis=-1, keepdims=True)
        e = jnp.exp(s)
        return e * pl.reciprocal(jnp.sum(e, axis=-1, keepdims=True), approx=True)

    def kernel(x_in_ref, w_enc_ref, b_enc_ref,
               wqkv_ref, wo_ref, wf1_ref, wf2_ref, lvec_ref,
               x_out_ref, x_scr):
        layer = pl.program_id(0)

        # ---- ColumnEncoder (block-diagonal matmul), first grid step only ----
        @pl.when(layer == 0)
        def _init():
            x_scr[...] = mm(x_in_ref[...], w_enc_ref[...]) + b_enc_ref[...]

        x = x_scr[...]                                  # (B, E) f32, resident
        B = x.shape[0]
        lv = lvec_ref[0]                                # (16, Wv) packed vectors
        b_q, b_k, b_v = lv[0:1, :E], lv[1:2, :E], lv[2:3, :E]
        b_o, g1, be1 = lv[3:4, :E], lv[4:5, :E], lv[5:6, :E]
        b_f1 = lv[6:7, :ff]
        b_f2, g2, be2 = lv[7:8, :E], lv[8:9, :E], lv[9:10, :E]

        # ---- multi-head self-attention across the B rows ----
        xb = x.astype(bf16)                             # cast once, reused q/k/v
        q = (jnp.dot(xb, wqkv_ref[0, 0], preferred_element_type=jnp.float32)
             + b_q).astype(bf16)
        k = (jnp.dot(xb, wqkv_ref[0, 1], preferred_element_type=jnp.float32)
             + b_k).astype(bf16)
        v = (jnp.dot(xb, wqkv_ref[0, 2], preferred_element_type=jnp.float32)
             + b_v).astype(bf16)

        # heads are packed contiguously inside E; disjoint head masks give the
        # per-head contraction without 128-lane-per-head padding or a concat.
        col = jax.lax.broadcasted_iota(jnp.int32, (1, E), 1)
        ctx = jnp.zeros((B, E), jnp.float32)
        for h in range(n_heads):
            mh = ((col >= h * hd) & (col < (h + 1) * hd)).astype(bf16)
            s = jax.lax.dot_general(q * mh, k, (((1,), (1,)), ((), ())),
                                    preferred_element_type=jnp.float32) * scale
            p = softmax_rows(s).astype(bf16)            # (B, B)
            ctx = ctx + jnp.dot(p, v * mh, preferred_element_type=jnp.float32)

        attn = mm(ctx, wo_ref[0]) + b_o                 # (B, E)

        x = ln(x + attn, g1, be1)
        h1 = jnp.maximum(mm(x, wf1_ref[0]) + b_f1, 0.0)
        x = ln(x + mm(h1, wf2_ref[0]) + b_f2, g2, be2)
        x_scr[...] = x

        @pl.when(layer == n_layers - 1)
        def _fin():
            x_out_ref[...] = x

    return kernel


# ------------------------------- tail kernel -----------------------------------


def make_tail_kernel(cfg):
    E, d_in, d_t = cfg["E"], cfg["d_in"], cfg["d_t"]
    num_feat, classes, task = cfg["num_feat"], cfg["classes"], cfg["task"]
    bf16 = jnp.bfloat16

    def mm(a, b):
        return jnp.dot(a.astype(bf16), b, preferred_element_type=jnp.float32)

    def silu(x):
        return x * pl.reciprocal(1.0 + jnp.exp(-x), approx=True)

    def kernel(x_ref, t_ref, wt2_ref, wp_ref, wm1_ref, wm2_ref,
               w_dec_ref, tvec_ref, out_ref):
        tv = tvec_ref[...]                              # (8, Wt) packed vectors
        wt1, bt1, bt2 = tv[0:1, :d_t], tv[1:2, :d_t], tv[2:3, :d_t]
        b_p = tv[3:4, :d_t]
        bm1, bm2 = tv[4:5, :2 * d_t], tv[5:6, :E]
        b_dec = tv[6:7, :d_in]

        x = x_ref[...]                                  # (B, E)
        t = t_ref[...]                                  # (B, 1)
        te = silu(t * wt1 + bt1)                        # (B, d_t) outer-product bcast
        te = mm(te, wt2_ref[...]) + bt2

        xp = mm(x, wp_ref[...]) + b_p + te
        h1 = silu(mm(xp, wm1_ref[...]) + bm1)
        xf = mm(h1, wm2_ref[...]) + bm2                 # (B, E)
        logits = mm(xf, w_dec_ref[...]) + b_dec         # (B, d_in)

        # output assembly: pass-through numeric cols, per-block softmax over
        # categorical cols, regression target column (or axis-0 softmax).
        col = jax.lax.broadcasted_iota(jnp.int32, logits.shape, 1)
        res = jnp.where(col < num_feat, logits, jnp.zeros_like(logits))
        cs = num_feat
        for val in classes:
            msk = (col >= cs) & (col < cs + val)
            neg = jnp.where(msk, logits, -1e30)
            mmax = jnp.max(neg, axis=1, keepdims=True)
            ee = jnp.where(msk, jnp.exp(neg - mmax), 0.0)
            probs = ee / jnp.sum(ee, axis=1, keepdims=True)   # exact for outputs
            res = jnp.where(msk, probs, res)
            cs += val
        if task == "regression":
            res = jnp.where(col == d_in - 1, logits, res)
        else:
            m2 = (col >= d_in - 2) & (col < d_in)
            e0 = jnp.exp(logits - jnp.max(logits, axis=0, keepdims=True))
            p0 = e0 / jnp.sum(e0, axis=0, keepdims=True)
            res = jnp.where(m2, p0, res)
        out_ref[...] = res

    return kernel


# --------------------------- parameter packing --------------------------------


def pack_tabby_params(params, cfg):
    E, d_in = cfg["E"], cfg["d_in"]
    ff, d_t, n_layers = cfg["ff"], cfg["d_t"], cfg["n_layers"]
    bf16 = jnp.bfloat16
    Wv = max(E, ff)
    Wt = max(2 * d_t, d_t, E, d_in)

    it = iter(params)
    nxt = lambda: next(it)
    w_enc, b_enc = nxt(), nxt()

    wqkv_s, wo_s, wf1_s, wf2_s, lvec_s = [], [], [], [], []
    for _ in range(n_layers):
        wq, bq, wk, bk, wv, bv = nxt(), nxt(), nxt(), nxt(), nxt(), nxt()
        wo, bo = nxt(), nxt()
        g1, be1 = nxt(), nxt()
        wf1, bf1, wf2, bf2 = nxt(), nxt(), nxt(), nxt()
        g2, be2 = nxt(), nxt()

        wqkv_s.append(jnp.stack([wq, wk, wv]))          # (3, E, E), compact
        wo_s.append(wo)
        wf1_s.append(wf1)
        wf2_s.append(wf2)

        lv = jnp.zeros((16, Wv), jnp.float32)
        for r, vec in enumerate((bq, bk, bv, bo, g1, be1, bf1, bf2, g2, be2)):
            vec = vec.reshape(-1).astype(jnp.float32)
            lv = lv.at[r, :vec.shape[0]].set(vec)
        lvec_s.append(lv)

    wt1, bt1, wt2, bt2 = nxt(), nxt(), nxt(), nxt()
    wp_, bp_ = nxt(), nxt()
    wm1, bm1, wm2, bm2 = nxt(), nxt(), nxt(), nxt()
    w_dec, b_dec = nxt(), nxt()

    tv = jnp.zeros((8, Wt), jnp.float32)
    for r, vec in enumerate((wt1, bt1, bt2, bp_, bm1, bm2, b_dec)):
        vec = vec.reshape(-1).astype(jnp.float32)
        tv = tv.at[r, :vec.shape[0]].set(vec)

    # TODO(synk): int8 (v5e/v6e) / fp8 (v7x) weight streaming would halve the
    # per-layer DMA bytes again but needs per-generation packing; kept bf16.
    return dict(
        w_enc=w_enc.astype(bf16),
        b_enc=b_enc.reshape(1, E).astype(jnp.float32),
        wqkv=jnp.stack(wqkv_s).astype(bf16),            # (L, 3, E, E)
        wo=jnp.stack(wo_s).astype(bf16),                # (L, E, E)
        wf1=jnp.stack(wf1_s).astype(bf16),              # (L, E, ff)
        wf2=jnp.stack(wf2_s).astype(bf16),              # (L, ff, E)
        lvec=jnp.stack(lvec_s),                         # (L, 16, Wv) f32
        wt2=wt2.astype(bf16), wp=wp_.astype(bf16),
        wm1=wm1.astype(bf16), wm2=wm2.astype(bf16),
        w_dec=w_dec.astype(bf16),
        tvec=tv,                                        # (8, Wt) f32
        Wv=Wv, Wt=Wt,
    )


# ------------------------------- wrapper ---------------------------------------


def tabby_forward(X, t, params, cfg):
    if t.ndim == 1:
        t = t[:, None]
    B = X.shape[0]
    E, d_in, ff = cfg["E"], cfg["d_in"], cfg["ff"]
    n_layers = cfg["n_layers"]
    assert cfg["n_heads"] * cfg["head_dim"] == E

    pk = pack_tabby_params(params, cfg)
    Wv = pk["Wv"]
    X = X.astype(jnp.float32)
    t = t.astype(jnp.float32)

    # ---- pass 1: encoder + n_layers transformer blocks (weights streamed) ----
    def nbytes(a):
        return int(a.size) * jnp.dtype(a.dtype).itemsize

    per_layer = sum(nbytes(pk[k]) for k in ("wqkv", "wo", "wf1", "wf2", "lvec"))
    per_layer //= max(n_layers, 1)
    resident = nbytes(X) + nbytes(pk["w_enc"]) + nbytes(pk["b_enc"]) + 2 * B * E * 4
    n_buf = 3 if n_layers >= 3 else 2      # deeper models: 3-deep weight pipeline
    vmem_limit = _vmem_limit_bytes(n_buf * per_layer + resident + (4 << 20))

    def layer_spec(block, imap, buffered=False):
        if buffered and n_buf > 2:
            return pl.BlockSpec(block, imap, pipeline_mode=pl.Buffered(n_buf))
        return pl.BlockSpec(block, imap)

    grid_spec = pltpu.PrefetchScalarGridSpec(
        num_scalar_prefetch=0,
        grid=(n_layers,),
        in_specs=[
            pl.BlockSpec((B, d_in), lambda l: (0, 0)),            # X (resident)
            pl.BlockSpec((d_in, E), lambda l: (0, 0)),            # encoder W (tiny)
            pl.BlockSpec((1, E), lambda l: (0, 0)),               # encoder bias
            layer_spec((1, 3, E, E), lambda l: (l, 0, 0, 0), buffered=True),
            layer_spec((1, E, E), lambda l: (l, 0, 0)),
            layer_spec((1, E, ff), lambda l: (l, 0, 0), buffered=True),
            layer_spec((1, ff, E), lambda l: (l, 0, 0), buffered=True),
            layer_spec((1, 16, Wv), lambda l: (l, 0, 0)),
        ],
        out_specs=pl.BlockSpec((B, E), lambda l: (0, 0)),
        scratch_shapes=[pltpu.VMEM((B, E), jnp.float32)],
    )

    x_mid = pl.pallas_call(
        make_body_kernel(cfg),
        out_shape=jax.ShapeDtypeStruct((B, E), jnp.float32),
        grid_spec=grid_spec,
        compiler_params=pltpu.CompilerParams(
            dimension_semantics=("arbitrary",),
            vmem_limit_bytes=vmem_limit,
        ),
    )(X, pk["w_enc"], pk["b_enc"], pk["wqkv"], pk["wo"],
      pk["wf1"], pk["wf2"], pk["lvec"])

    # ---- pass 2: time embed + proj + mlp + decoder + output assembly ----
    # Tail constants never ride through the layer loop's VMEM; everything here
    # is small enough to live fully in VMEM for a single un-gridded call.
    out = pl.pallas_call(
        make_tail_kernel(cfg),
        out_shape=jax.ShapeDtypeStruct((B, d_in), jnp.float32),
    )(x_mid, t, pk["wt2"], pk["wp"], pk["wm1"], pk["wm2"], pk["w_dec"], pk["tvec"])
    return out


# ------------------------- pure-JAX reference --------------------------------


def tabby_reference(X, t, params, cfg):
    E, hd, nh = cfg["E"], cfg["head_dim"], cfg["n_heads"]
    it = iter(params)
    nxt = lambda: next(it)
    if t.ndim == 1:
        t = t[:, None]
    X = X.astype(jnp.float32)
    t = t.astype(jnp.float32)

    w_enc, b_enc = nxt(), nxt()
    x = X @ w_enc + b_enc
    for _ in range(cfg["n_layers"]):
        wq, bq, wk, bk, wv, bv = nxt(), nxt(), nxt(), nxt(), nxt(), nxt()
        wo, bo = nxt(), nxt()
        g1, be1 = nxt(), nxt()
        wf1, bf1, wf2, bf2 = nxt(), nxt(), nxt(), nxt()
        g2, be2 = nxt(), nxt()
        q, k, v = x @ wq + bq, x @ wk + bk, x @ wv + bv
        outs = []
        for h in range(nh):
            qh, kh, vh = (z[:, h * hd:(h + 1) * hd] for z in (q, k, v))
            a = jax.nn.softmax(qh @ kh.T / (hd ** 0.5), axis=-1)
            outs.append(a @ vh)
        attn = jnp.concatenate(outs, axis=-1) @ wo + bo
        x = _layernorm(x + attn, g1, be1)
        ff = jnp.maximum(x @ wf1 + bf1, 0.0) @ wf2 + bf2
        x = _layernorm(x + ff, g2, be2)
    wt1, bt1, wt2, bt2 = nxt(), nxt(), nxt(), nxt()
    te = jax.nn.silu(t @ wt1 + bt1) @ wt2 + bt2
    wp, bp = nxt(), nxt()
    xp = x @ wp + bp + te
    wm1, bm1, wm2, bm2 = nxt(), nxt(), nxt(), nxt()
    xf = jax.nn.silu(xp @ wm1 + bm1) @ wm2 + bm2
    wd, bd = nxt(), nxt()
    logits = xf @ wd + bd
    res = jnp.zeros_like(logits)
    nf = cfg["num_feat"]
    res = res.at[:, :nf].set(logits[:, :nf])
    cs = nf
    for val in cfg["classes"]:
        res = res.at[:, cs:cs + val].set(jax.nn.softmax(logits[:, cs:cs + val], axis=1))
        cs += val
    if cfg["task"] == "regression":
        res = res.at[:, -1].set(logits[:, -1])
    else:
        res = res.at[:, -2:].set(jax.nn.softmax(logits[:, -2:], axis=0))
    return res


# ------------------------------- main ----------------------------------------


if __name__ == "__main__":
    # small config consistent with Tabby.__init__
    num_feat, classes = 3, [2, 2]
    d_in = num_feat + sum(classes) + 1          # 3 numeric + 2 one-hot blocks + target
    d_model, n_heads, n_layers, ff_factor, d_t = 4, 2, 1, 2, 128
    E = d_in * d_model
    assert d_t > E
    cfg = dict(d_in=d_in, d_model=d_model, E=E, n_heads=n_heads,
               head_dim=E // n_heads, n_layers=n_layers, ff=ff_factor * E,
               d_t=d_t, num_feat=num_feat, classes=classes, task="regression")
    B = 8

    key = jax.random.PRNGKey(0)
    kx, kt, kp = jax.random.split(key, 3)
    X = jax.random.normal(kx, (B, d_in), dtype=jnp.float32)
    t = jax.random.uniform(kt, (B,), dtype=jnp.float32)

    keys = iter(jax.random.split(kp, 128))
    rnd = lambda shape, s=0.1: (s * jax.random.normal(next(keys), shape)).astype(jnp.float32)

    # ColumnEncoder -> block-diagonal (d_in, E) matrix
    We, be = rnd((d_in, d_model)), rnd((d_in, d_model))
    w_enc = (jnp.eye(d_in, dtype=jnp.float32)[:, :, None] * We[None, :, :]).reshape(d_in, E)
    b_enc = be.reshape(1, E)

    params = [w_enc, b_enc]
    ffE = cfg["ff"]
    for _ in range(n_layers):
        for _ in range(3):                                   # q, k, v projections
            params += [rnd((E, E)), rnd((1, E))]
        params += [rnd((E, E)), rnd((1, E))]                 # out_proj
        params += [jnp.ones((1, E), jnp.float32), jnp.zeros((1, E), jnp.float32)]  # norm1
        params += [rnd((E, ffE)), rnd((1, ffE)), rnd((ffE, E)), rnd((1, E))]       # ff
        params += [jnp.ones((1, E), jnp.float32), jnp.zeros((1, E), jnp.float32)]  # norm2

    params += [rnd((1, d_t)), rnd((1, d_t)), rnd((d_t, d_t)), rnd((1, d_t))]       # time_embed
    params += [rnd((E, d_t)), rnd((1, d_t))]                                       # proj
    params += [rnd((d_t, 2 * d_t)), rnd((1, 2 * d_t)),
               rnd((2 * d_t, E)), rnd((1, E))]                                     # mlp

    # ColumnDecoder -> block-diagonal (E, d_in) matrix
    Wd, bd_ = rnd((d_in, d_model)), rnd((1, d_in))
    w_dec = (jnp.eye(d_in, dtype=jnp.float32)[:, None, :] * Wd.T[None, :, :]).reshape(E, d_in)
    params += [w_dec, bd_]

    out = tabby_forward(X, t, params, cfg)
    out = jax.block_until_ready(out)

    ref = jax.block_until_ready(tabby_reference(X, t, params, cfg))
    if not jnp.allclose(out, ref, atol=5e-2, rtol=5e-2):
        raise AssertionError("Pallas kernel output does not match reference")

    print("KERNEL_OK")
</pallas_src>

<mosaic_0001>
module attributes {stable_mosaic.version = 11 : i64} {
  func.func @kernel(%arg0: i32, %arg1: memref<8x8xf32, #tpu.memory_space<vmem>>, %arg2: memref<8x32xbf16, #tpu.memory_space<vmem>>, %arg3: memref<1x32xf32, #tpu.memory_space<vmem>>, %arg4: memref<1x3x32x32xbf16, #tpu.memory_space<vmem>>, %arg5: memref<1x32x32xbf16, #tpu.memory_space<vmem>>, %arg6: memref<1x32x64xbf16, #tpu.memory_space<vmem>>, %arg7: memref<1x64x32xbf16, #tpu.memory_space<vmem>>, %arg8: memref<1x16x64xf32, #tpu.memory_space<vmem>>, %arg9: memref<8x32xf32, #tpu.memory_space<vmem>>, %arg10: memref<8x32xf32, #tpu.memory_space<vmem>>) attributes {dimension_semantics = [#tpu.dimension_semantics<arbitrary>], iteration_bounds = array<i64: 1>, scalar_prefetch = 0 : i64, scratch_operands = 1 : i64, tpu.core_type = #tpu.core_type<tc>, window_params = [{pipeline_mode = #tpu.pipeline_mode<synchronous>, transform_indices = @transform_0, window_bounds = array<i64: 8, 8>}, {pipeline_mode = #tpu.pipeline_mode<synchronous>, transform_indices = @transform_1, window_bounds = array<i64: 8, 32>}, {pipeline_mode = #tpu.pipeline_mode<synchronous>, transform_indices = @transform_2, window_bounds = array<i64: 1, 32>}, {transform_indices = @transform_3, window_bounds = array<i64: 1, 3, 32, 32>}, {transform_indices = @transform_4, window_bounds = array<i64: 1, 32, 32>}, {transform_indices = @transform_5, window_bounds = array<i64: 1, 32, 64>}, {transform_indices = @transform_6, window_bounds = array<i64: 1, 64, 32>}, {transform_indices = @transform_7, window_bounds = array<i64: 1, 16, 64>}, {pipeline_mode = #tpu.pipeline_mode<synchronous>, transform_indices = @transform_8, window_bounds = array<i64: 8, 32>}]} {
    %c0_i32 = arith.constant 0 : i32
    %0 = arith.cmpi eq, %arg0, %c0_i32 : i32
    %1 = arith.extui %0 : i1 to i32
    %c0_i32_0 = arith.constant 0 : i32
    %2 = arith.cmpi ne, %1, %c0_i32_0 : i32
    scf.if %2 {
      %c0_57 = arith.constant 0 : index
      %c0_58 = arith.constant 0 : index
      %163 = vector.load %arg1[%c0_57, %c0_58] : memref<8x8xf32, #tpu.memory_space<vmem>>, vector<8x8xf32>
      %c0_59 = arith.constant 0 : index
      %c0_60 = arith.constant 0 : index
      %164 = vector.load %arg2[%c0_59, %c0_60] : memref<8x32xbf16, #tpu.memory_space<vmem>>, vector<8x32xbf16>
      %165 = arith.truncf %163 : vector<8x8xf32> to vector<8x8xbf16>
      %cst_61 = arith.constant dense<0.000000e+00> : vector<8x32xf32>
      %166 = tpu.matmul %165, %164, %cst_61 {dimension_numbers = #tpu.dot_dimension_numbers<[1], [0], [0], [1], [0, 0, 1, 1], [], []>} : vector<8x8xbf16>, vector<8x32xbf16>, vector<8x32xf32> -> vector<8x32xf32>
      %c0_62 = arith.constant 0 : index
      %c0_63 = arith.constant 0 : index
      %167 = vector.load %arg3[%c0_62, %c0_63] : memref<1x32xf32, #tpu.memory_space<vmem>>, vector<1x32xf32>
      %168 = vector.broadcast %167 : vector<1x32xf32> to vector<8x32xf32>
      %169 = arith.addf %166, %168 : vector<8x32xf32>
      %c0_64 = arith.constant 0 : index
      %c0_65 = arith.constant 0 : index
      %170 = vector.load %arg10[%c0_64, %c0_65] : memref<8x32xf32, #tpu.memory_space<vmem>>, vector<8x32xf32>
      tpu.vector_store %arg10[%c0_64, %c0_65], %169 {strides = array<i32>} : memref<8x32xf32, #tpu.memory_space<vmem>>, vector<8x32xf32>,
    } else {
    }
    %c0 = arith.constant 0 : index
    %c0_1 = arith.constant 0 : index
    %3 = vector.load %arg10[%c0, %c0_1] : memref<8x32xf32, #tpu.memory_space<vmem>>, vector<8x32xf32>
    %c0_2 = arith.constant 0 : index
    %c0_3 = arith.constant 0 : index
    %c0_4 = arith.constant 0 : index
    %4 = vector.load %arg8[%c0_2, %c0_3, %c0_4] : memref<1x16x64xf32, #tpu.memory_space<vmem>>, vector<1x16x64xf32>
    %5 = vector.shape_cast %4 : vector<1x16x64xf32> to vector<16x64xf32>
    %6 = vector.extract_strided_slice %5 {offsets = [0, 0], sizes = [1, 32], strides = [1, 1]} : vector<16x64xf32> to vector<1x32xf32>
    %7 = vector.extract_strided_slice %5 {offsets = [1, 0], sizes = [1, 32], strides = [1, 1]} : vector<16x64xf32> to vector<1x32xf32>
    %8 = vector.extract_strided_slice %5 {offsets = [2, 0], sizes = [1, 32], strides = [1, 1]} : vector<16x64xf32> to vector<1x32xf32>
    %9 = vector.extract_strided_slice %5 {offsets = [3, 0], sizes = [1, 32], strides = [1, 1]} : vector<16x64xf32> to vector<1x32xf32>
    %10 = vector.extract_strided_slice %5 {offsets = [4, 0], sizes = [1, 32], strides = [1, 1]} : vector<16x64xf32> to vector<1x32xf32>
    %11 = vector.extract_strided_slice %5 {offsets = [5, 0], sizes = [1, 32], strides = [1, 1]} : vector<16x64xf32> to vector<1x32xf32>
    %12 = vector.extract_strided_slice %5 {offsets = [6, 0], sizes = [1, 64], strides = [1, 1]} : vector<16x64xf32> to vector<1x64xf32>
    %13 = vector.extract_strided_slice %5 {offsets = [7, 0], sizes = [1, 32], strides = [1, 1]} : vector<16x64xf32> to vector<1x32xf32>
    %14 = vector.extract_strided_slice %5 {offsets = [8, 0], sizes = [1, 32], strides = [1, 1]} : vector<16x64xf32> to vector<1x32xf32>
    %15 = vector.extract_strided_slice %5 {offsets = [9, 0], sizes = [1, 32], strides = [1, 1]} : vector<16x64xf32> to vector<1x32xf32>
    %16 = arith.truncf %3 : vector<8x32xf32> to vector<8x32xbf16>
    %c0_5 = arith.constant 0 : index
    %c0_6 = arith.constant 0 : index
    %c0_7 = arith.constant 0 : index
    %c0_8 = arith.constant 0 : index
    %17 = vector.load %arg4[%c0_5, %c0_6, %c0_7, %c0_8] : memref<1x3x32x32xbf16, #tpu.memory_space<vmem>>, vector<1x1x32x32xbf16>
    %18 = vector.shape_cast %17 : vector<1x1x32x32xbf16> to vector<32x32xbf16>
    %cst = arith.constant dense<0.000000e+00> : vector<8x32xf32>
    %19 = tpu.matmul %16, %18, %cst {dimension_numbers = #tpu.dot_dimension_numbers<[1], [0], [0], [1], [0, 0, 1, 1], [], []>} : vector<8x32xbf16>, vector<32x32xbf16>, vector<8x32xf32> -> vector<8x32xf32>
    %20 = vector.broadcast %6 : vector<1x32xf32> to vector<8x32xf32>
    %21 = arith.addf %19, %20 : vector<8x32xf32>
    %22 = arith.truncf %21 : vector<8x32xf32> to vector<8x32xbf16>
    %c0_9 = arith.constant 0 : index
    %c1 = arith.constant 1 : index
    %c0_10 = arith.constant 0 : index
    %c0_11 = arith.constant 0 : index
    %23 = vector.load %arg4[%c0_9, %c1, %c0_10, %c0_11] : memref<1x3x32x32xbf16, #tpu.memory_space<vmem>>, vector<1x1x32x32xbf16>
    %24 = vector.shape_cast %23 : vector<1x1x32x32xbf16> to vector<32x32xbf16>
    %cst_12 = arith.constant dense<0.000000e+00> : vector<8x32xf32>
    %25 = tpu.matmul %16, %24, %cst_12 {dimension_numbers = #tpu.dot_dimension_numbers<[1], [0], [0], [1], [0, 0, 1, 1], [], []>} : vector<8x32xbf16>, vector<32x32xbf16>, vector<8x32xf32> -> vector<8x32xf32>
    %26 = vector.broadcast %7 : vector<1x32xf32> to vector<8x32xf32>
    %27 = arith.addf %25, %26 : vector<8x32xf32>
    %28 = arith.truncf %27 : vector<8x32xf32> to vector<8x32xbf16>
    %c0_13 = arith.constant 0 : index
    %c2 = arith.constant 2 : index
    %c0_14 = arith.constant 0 : index
    %c0_15 = arith.constant 0 : index
    %29 = vector.load %arg4[%c0_13, %c2, %c0_14, %c0_15] : memref<1x3x32x32xbf16, #tpu.memory_space<vmem>>, vector<1x1x32x32xbf16>
    %30 = vector.shape_cast %29 : vector<1x1x32x32xbf16> to vector<32x32xbf16>
    %cst_16 = arith.constant dense<0.000000e+00> : vector<8x32xf32>
    %31 = tpu.matmul %16, %30, %cst_16 {dimension_numbers = #tpu.dot_dimension_numbers<[1], [0], [0], [1], [0, 0, 1, 1], [], []>} : vector<8x32xbf16>, vector<32x32xbf16>, vector<8x32xf32> -> vector<8x32xf32>
    %32 = vector.broadcast %8 : vector<1x32xf32> to vector<8x32xf32>
    %33 = arith.addf %31, %32 : vector<8x32xf32>
    %34 = arith.truncf %33 : vector<8x32xf32> to vector<8x32xbf16>
    %35 = tpu.iota {dimensions = array<i32: 1>} : vector<1x32xi32>
    %cst_17 = arith.constant 0.000000e+00 : f32
    %36 = vector.broadcast %cst_17 : f32 to vector<8x32xf32>
    %c0_i32_18 = arith.constant 0 : i32
    %37 = vector.broadcast %c0_i32_18 : i32 to vector<1x32xi32>
    %38 = arith.cmpi sge, %35, %37 : vector<1x32xi32>
    %c16_i32 = arith.constant 16 : i32
    %39 = vector.broadcast %c16_i32 : i32 to vector<1x32xi32>
    %40 = arith.cmpi slt, %35, %39 : vector<1x32xi32>
    %41 = arith.andi %38, %40 : vector<1x32xi1>
    %42 = arith.extui %41 : vector<1x32xi1> to vector<1x32xi32>
    %43 = arith.sitofp %42 : vector<1x32xi32> to vector<1x32xf32>
    %44 = arith.truncf %43 : vector<1x32xf32> to vector<1x32xbf16>
    %45 = vector.broadcast %44 : vector<1x32xbf16> to vector<8x32xbf16>
    %46 = arith.mulf %22, %45 : vector<8x32xbf16>
    %cst_19 = arith.constant dense<0.000000e+00> : vector<8x8xf32>
    %47 = tpu.matmul %46, %28, %cst_19 {dimension_numbers = #tpu.dot_dimension_numbers<[1], [1], [0], [0], [0, 0, 1, 0], [], []>} : vector<8x32xbf16>, vector<8x32xbf16>, vector<8x8xf32> -> vector<8x8xf32>
    %cst_20 = arith.constant 2.500000e-01 : f32
    %48 = vector.broadcast %cst_20 : f32 to vector<8x8xf32>
    %49 = arith.mulf %47, %48 : vector<8x8xf32>
    %cst_21 = arith.constant dense<0xFF800000> : vector<8xf32>
    %50 = vector.multi_reduction <maximumf>, %49, %cst_21 [1] : vector<8x8xf32> to vector<8xf32>
    %51 = vector.shape_cast %50 : vector<8xf32> to vector<8x1xf32>
    %52 = vector.broadcast %51 : vector<8x1xf32> to vector<8x8xf32>
    %53 = arith.subf %49, %52 : vector<8x8xf32>
    %54 = math.exp %53 : vector<8x8xf32>
    %cst_22 = arith.constant dense<0.000000e+00> : vector<8xf32>
    %55 = vector.multi_reduction <add>, %54, %cst_22 [1] : vector<8x8xf32> to vector<8xf32>
    %56 = vector.shape_cast %55 : vector<8xf32> to vector<8x1xf32>
    %57 = tpu.reciprocal %56 {approx = true} : vector<8x1xf32> -> vector<8x1xf32>
    %58 = vector.broadcast %57 : vector<8x1xf32> to vector<8x8xf32>
    %59 = arith.mulf %54, %58 : vector<8x8xf32>
    %60 = arith.truncf %59 : vector<8x8xf32> to vector<8x8xbf16>
    %61 = vector.broadcast %44 : vector<1x32xbf16> to vector<8x32xbf16>
    %62 = arith.mulf %34, %61 : vector<8x32xbf16>
    %cst_23 = arith.constant dense<0.000000e+00> : vector<8x32xf32>
    %63 = tpu.matmul %60, %62, %cst_23 {dimension_numbers = #tpu.dot_dimension_numbers<[1], [0], [0], [1], [0, 0, 1, 1], [], []>} : vector<8x8xbf16>, vector<8x32xbf16>, vector<8x32xf32> -> vector<8x32xf32>
    %64 = arith.addf %36, %63 : vector<8x32xf32>
    %c16_i32_24 = arith.constant 16 : i32
    %65 = vector.broadcast %c16_i32_24 : i32 to vector<1x32xi32>
    %66 = arith.cmpi sge, %35, %65 : vector<1x32xi32>
    %c32_i32 = arith.constant 32 : i32
    %67 = vector.broadcast %c32_i32 : i32 to vector<1x32xi32>
    %68 = arith.cmpi slt, %35, %67 : vector<1x32xi32>
    %69 = arith.andi %66, %68 : vector<1x32xi1>
    %70 = arith.extui %69 : vector<1x32xi1> to vector<1x32xi32>
    %71 = arith.sitofp %70 : vector<1x32xi32> to vector<1x32xf32>
    %72 = arith.truncf %71 : vector<1x32xf32> to vector<1x32xbf16>
    %73 = vector.broadcast %72 : vector<1x32xbf16> to vector<8x32xbf16>
    %74 = arith.mulf %22, %73 : vector<8x32xbf16>
    %cst_25 = arith.constant dense<0.000000e+00> : vector<8x8xf32>
    %75 = tpu.matmul %74, %28, %cst_25 {dimension_numbers = #tpu.dot_dimension_numbers<[1], [1], [0], [0], [0, 0, 1, 0], [], []>} : vector<8x32xbf16>, vector<8x32xbf16>, vector<8x8xf32> -> vector<8x8xf32>
    %cst_26 = arith.constant 2.500000e-01 : f32
    %76 = vector.broadcast %cst_26 : f32 to vector<8x8xf32>
    %77 = arith.mulf %75, %76 : vector<8x8xf32>
    %cst_27 = arith.constant dense<0xFF800000> : vector<8xf32>
    %78 = vector.multi_reduction <maximumf>, %77, %cst_27 [1] : vector<8x8xf32> to vector<8xf32>
    %79 = vector.shape_cast %78 : vector<8xf32> to vector<8x1xf32>
    %80 = vector.broadcast %79 : vector<8x1xf32> to vector<8x8xf32>
    %81 = arith.subf %77, %80 : vector<8x8xf32>
    %82 = math.exp %81 : vector<8x8xf32>
    %cst_28 = arith.constant dense<0.000000e+00> : vector<8xf32>
    %83 = vector.multi_reduction <add>, %82, %cst_28 [1] : vector<8x8xf32> to vector<8xf32>
    %84 = vector.shape_cast %83 : vector<8xf32> to vector<8x1xf32>
    %85 = tpu.reciprocal %84 {approx = true} : vector<8x1xf32> -> vector<8x1xf32>
    %86 = vector.broadcast %85 : vector<8x1xf32> to vector<8x8xf32>
    %87 = arith.mulf %82, %86 : vector<8x8xf32>
    %88 = arith.truncf %87 : vector<8x8xf32> to vector<8x8xbf16>
    %89 = vector.broadcast %72 : vector<1x32xbf16> to vector<8x32xbf16>
    %90 = arith.mulf %34, %89 : vector<8x32xbf16>
    %cst_29 = arith.constant dense<0.000000e+00> : vector<8x32xf32>
    %91 = tpu.matmul %88, %90, %cst_29 {dimension_numbers = #tpu.dot_dimension_numbers<[1], [0], [0], [1], [0, 0, 1, 1], [], []>} : vector<8x8xbf16>, vector<8x32xbf16>, vector<8x32xf32> -> vector<8x32xf32>
    %92 = arith.addf %64, %91 : vector<8x32xf32>
    %c0_30 = arith.constant 0 : index
    %c0_31 = arith.constant 0 : index
    %c0_32 = arith.constant 0 : index
    %93 = vector.load %arg5[%c0_30, %c0_31, %c0_32] : memref<1x32x32xbf16, #tpu.memory_space<vmem>>, vector<1x32x32xbf16>
    %94 = vector.shape_cast %93 : vector<1x32x32xbf16> to vector<32x32xbf16>
    %95 = arith.truncf %92 : vector<8x32xf32> to vector<8x32xbf16>
    %cst_33 = arith.constant dense<0.000000e+00> : vector<8x32xf32>
    %96 = tpu.matmul %95, %94, %cst_33 {dimension_numbers = #tpu.dot_dimension_numbers<[1], [0], [0], [1], [0, 0, 1, 1], [], []>} : vector<8x32xbf16>, vector<32x32xbf16>, vector<8x32xf32> -> vector<8x32xf32>
    %97 = vector.broadcast %9 : vector<1x32xf32> to vector<8x32xf32>
    %98 = arith.addf %96, %97 : vector<8x32xf32>
    %99 = arith.addf %3, %98 : vector<8x32xf32>
    %cst_34 = arith.constant dense<0.000000e+00> : vector<8xf32>
    %100 = vector.multi_reduction <add>, %99, %cst_34 [1] : vector<8x32xf32> to vector<8xf32>
    %101 = vector.shape_cast %100 : vector<8xf32> to vector<8x1xf32>
    %cst_35 = arith.constant 3.200000e+01 : f32
    %102 = vector.broadcast %cst_35 : f32 to vector<8x1xf32>
    %103 = arith.divf %101, %102 : vector<8x1xf32>
    %104 = vector.broadcast %103 : vector<8x1xf32> to vector<8x32xf32>
    %105 = arith.subf %99, %104 : vector<8x32xf32>
    %106 = arith.mulf %105, %105 : vector<8x32xf32>
    %cst_36 = arith.constant dense<0.000000e+00> : vector<8xf32>
    %107 = vector.multi_reduction <add>, %106, %cst_36 [1] : vector<8x32xf32> to vector<8xf32>
    %108 = vector.shape_cast %107 : vector<8xf32> to vector<8x1xf32>
    %cst_37 = arith.constant 3.200000e+01 : f32
    %109 = vector.broadcast %cst_37 : f32 to vector<8x1xf32>
    %110 = arith.divf %108, %109 : vector<8x1xf32>
    %111 = vector.broadcast %103 : vector<8x1xf32> to vector<8x32xf32>
    %112 = arith.subf %99, %111 : vector<8x32xf32>
    %cst_38 = arith.constant 9.99999974E-6 : f32
    %113 = vector.broadcast %cst_38 : f32 to vector<8x1xf32>
    %114 = arith.addf %110, %113 : vector<8x1xf32>
    %115 = math.rsqrt %114 : vector<8x1xf32>
    %116 = vector.broadcast %115 : vector<8x1xf32> to vector<8x32xf32>
    %117 = arith.mulf %112, %116 : vector<8x32xf32>
    %118 = vector.broadcast %10 : vector<1x32xf32> to vector<8x32xf32>
    %119 = arith.mulf %117, %118 : vector<8x32xf32>
    %120 = vector.broadcast %11 : vector<1x32xf32> to vector<8x32xf32>
    %121 = arith.addf %119, %120 : vector<8x32xf32>
    %c0_39 = arith.constant 0 : index
    %c0_40 = arith.constant 0 : index
    %c0_41 = arith.constant 0 : index
    %122 = vector.load %arg6[%c0_39, %c0_40, %c0_41] : memref<1x32x64xbf16, #tpu.memory_space<vmem>>, vector<1x32x64xbf16>
    %123 = vector.shape_cast %122 : vector<1x32x64xbf16> to vector<32x64xbf16>
    %124 = arith.truncf %121 : vector<8x32xf32> to vector<8x32xbf16>
    %cst_42 = arith.constant dense<0.000000e+00> : vector<8x64xf32>
    %125 = tpu.matmul %124, %123, %cst_42 {dimension_numbers = #tpu.dot_dimension_numbers<[1], [0], [0], [1], [0, 0, 1, 1], [], []>} : vector<8x32xbf16>, vector<32x64xbf16>, vector<8x64xf32> -> vector<8x64xf32>
    %126 = vector.broadcast %12 : vector<1x64xf32> to vector<8x64xf32>
    %127 = arith.addf %125, %126 : vector<8x64xf32>
    %cst_43 = arith.constant 0.000000e+00 : f32
    %128 = vector.broadcast %cst_43 : f32 to vector<8x64xf32>
    %129 = arith.maximumf %127, %128 : vector<8x64xf32>
    %c0_44 = arith.constant 0 : index
    %c0_45 = arith.constant 0 : index
    %c0_46 = arith.constant 0 : index
    %130 = vector.load %arg7[%c0_44, %c0_45, %c0_46] : memref<1x64x32xbf16, #tpu.memory_space<vmem>>, vector<1x64x32xbf16>
    %131 = vector.shape_cast %130 : vector<1x64x32xbf16> to vector<64x32xbf16>
    %132 = arith.truncf %129 : vector<8x64xf32> to vector<8x64xbf16>
    %cst_47 = arith.constant dense<0.000000e+00> : vector<8x32xf32>
    %133 = tpu.matmul %132, %131, %cst_47 {dimension_numbers = #tpu.dot_dimension_numbers<[1], [0], [0], [1], [0, 0, 1, 1], [], []>} : vector<8x64xbf16>, vector<64x32xbf16>, vector<8x32xf32> -> vector<8x32xf32>
    %134 = arith.addf %121, %133 : vector<8x32xf32>
    %135 = vector.broadcast %13 : vector<1x32xf32> to vector<8x32xf32>
    %136 = arith.addf %134, %135 : vector<8x32xf32>
    %cst_48 = arith.constant dense<0.000000e+00> : vector<8xf32>
    %137 = vector.multi_reduction <add>, %136, %cst_48 [1] : vector<8x32xf32> to vector<8xf32>
    %138 = vector.shape_cast %137 : vector<8xf32> to vector<8x1xf32>
    %cst_49 = arith.constant 3.200000e+01 : f32
    %139 = vector.broadcast %cst_49 : f32 to vector<8x1xf32>
    %140 = arith.divf %138, %139 : vector<8x1xf32>
    %141 = vector.broadcast %140 : vector<8x1xf32> to vector<8x32xf32>
    %142 = arith.subf %136, %141 : vector<8x32xf32>
    %143 = arith.mulf %142, %142 : vector<8x32xf32>
    %cst_50 = arith.constant dense<0.000000e+00> : vector<8xf32>
    %144 = vector.multi_reduction <add>, %143, %cst_50 [1] : vector<8x32xf32> to vector<8xf32>
    %145 = vector.shape_cast %144 : vector<8xf32> to vector<8x1xf32>
    %cst_51 = arith.constant 3.200000e+01 : f32
    %146 = vector.broadcast %cst_51 : f32 to vector<8x1xf32>
    %147 = arith.divf %145, %146 : vector<8x1xf32>
    %148 = vector.broadcast %140 : vector<8x1xf32> to vector<8x32xf32>
    %149 = arith.subf %136, %148 : vector<8x32xf32>
    %cst_52 = arith.constant 9.99999974E-6 : f32
    %150 = vector.broadcast %cst_52 : f32 to vector<8x1xf32>
    %151 = arith.addf %147, %150 : vector<8x1xf32>
    %152 = math.rsqrt %151 : vector<8x1xf32>
    %153 = vector.broadcast %152 : vector<8x1xf32> to vector<8x32xf32>
    %154 = arith.mulf %149, %153 : vector<8x32xf32>
    %155 = vector.broadcast %14 : vector<1x32xf32> to vector<8x32xf32>
    %156 = arith.mulf %154, %155 : vector<8x32xf32>
    %157 = vector.broadcast %15 : vector<1x32xf32> to vector<8x32xf32>
    %158 = arith.addf %156, %157 : vector<8x32xf32>
    %c0_53 = arith.constant 0 : index
    %c0_54 = arith.constant 0 : index
    %159 = vector.load %arg10[%c0_53, %c0_54] : memref<8x32xf32, #tpu.memory_space<vmem>>, vector<8x32xf32>
    tpu.vector_store %arg10[%c0_53, %c0_54], %158 {strides = array<i32>} : memref<8x32xf32, #tpu.memory_space<vmem>>, vector<8x32xf32>,
    %c0_i32_55 = arith.constant 0 : i32
    %160 = arith.cmpi eq, %arg0, %c0_i32_55 : i32
    %161 = arith.extui %160 : i1 to i32
    %c0_i32_56 = arith.constant 0 : i32
    %162 = arith.cmpi ne, %161, %c0_i32_56 : i32
    scf.if %162 {
      %c0_57 = arith.constant 0 : index
      %c0_58 = arith.constant 0 : index
      %163 = vector.load %arg9[%c0_57, %c0_58] : memref<8x32xf32, #tpu.memory_space<vmem>>, vector<8x32xf32>
      tpu.vector_store %arg9[%c0_57, %c0_58], %158 {strides = array<i32>} : memref<8x32xf32, #tpu.memory_space<vmem>>, vector<8x32xf32>,
    } else {
    }
    return
  }
  func.func @transform_0(%arg0: i32) -> (i32, i32) {
    %c0_i32 = arith.constant 0 : i32
    %c0_i32_0 = arith.constant 0 : i32
    %c0_i32_1 = arith.constant 0 : i32
    return %c0_i32, %c0_i32_0 : i32, i32
  }
  func.func @transform_1(%arg0: i32) -> (i32, i32) {
    %c0_i32 = arith.constant 0 : i32
    %c0_i32_0 = arith.constant 0 : i32
    %c0_i32_1 = arith.constant 0 : i32
    return %c0_i32, %c0_i32_0 : i32, i32
  }
  func.func @transform_2(%arg0: i32) -> (i32, i32) {
    %c0_i32 = arith.constant 0 : i32
    %c0_i32_0 = arith.constant 0 : i32
    %c0_i32_1 = arith.constant 0 : i32
    return %c0_i32, %c0_i32_0 : i32, i32
  }
  func.func @transform_3(%arg0: i32) -> (i32, i32, i32, i32) {
    %c0_i32 = arith.constant 0 : i32
    %c0_i32_0 = arith.constant 0 : i32
    %c0_i32_1 = arith.constant 0 : i32
    %c0_i32_2 = arith.constant 0 : i32
    return %arg0, %c0_i32, %c0_i32_0, %c0_i32_1 : i32, i32, i32, i32
  }
  func.func @transform_4(%arg0: i32) -> (i32, i32, i32) {
    %c0_i32 = arith.constant 0 : i32
    %c0_i32_0 = arith.constant 0 : i32
    %c0_i32_1 = arith.constant 0 : i32
    return %arg0, %c0_i32, %c0_i32_0 : i32, i32, i32
  }
  func.func @transform_5(%arg0: i32) -> (i32, i32, i32) {
    %c0_i32 = arith.constant 0 : i32
    %c0_i32_0 = arith.constant 0 : i32
    %c0_i32_1 = arith.constant 0 : i32
    return %arg0, %c0_i32, %c0_i32_0 : i32, i32, i32
  }
  func.func @transform_6(%arg0: i32) -> (i32, i32, i32) {
    %c0_i32 = arith.constant 0 : i32
    %c0_i32_0 = arith.constant 0 : i32
    %c0_i32_1 = arith.constant 0 : i32
    return %arg0, %c0_i32, %c0_i32_0 : i32, i32, i32
  }
  func.func @transform_7(%arg0: i32) -> (i32, i32, i32) {
    %c0_i32 = arith.constant 0 : i32
    %c0_i32_0 = arith.constant 0 : i32
    %c0_i32_1 = arith.constant 0 : i32
    return %arg0, %c0_i32, %c0_i32_0 : i32, i32, i32
  }
  func.func @transform_8(%arg0: i32) -> (i32, i32) {
    %c0_i32 = arith.constant 0 : i32
    %c0_i32_0 = arith.constant 0 : i32
    %c0_i32_1 = arith.constant 0 : i32
    return %c0_i32, %c0_i32_0 : i32, i32
  }
}

</mosaic_0001>

<bundles_post_ra>
// kernel: tpu_custom_call.1
= control target key start
LH: loop header
LB: loop body
LE: loop exit
PB: predicated region body
PF: predicated region fallthrough
CT: control target
= control target key end

     0   :  { %13 = vsyncpa [#allocation4], 0  ;;  %s993_s0 = inlined_call_operand.hbm [shape: f32[8,8], index: 0, kind: input, shape index: {}]   ;;  %s994_s1 = inlined_call_operand.hbm [shape: bf16[8,32], index: 1, kind: input, shape index: {}]   ;;  %s995_s2 = inlined_call_operand.vmem [shape: f32[1,32], index: 2, kind: input, shape index: {}]   ;;  %s996_s3 = inlined_call_operand.vmem [shape: bf16[1,3,32,32], index: 3, kind: input, shape index: {}]   ;;  %s997_s4 = inlined_call_operand.hbm [shape: bf16[1,32,32], index: 4, kind: input, shape index: {}]   ;;  %s998_s5 = inlined_call_operand.hbm [shape: bf16[1,32,64], index: 5, kind: input, shape index: {}]   ;;  %s999_s6 = inlined_call_operand.vmem [shape: bf16[1,64,32], index: 6, kind: input, shape index: {}]   ;;  %s1000_s7 = inlined_call_operand.hbm [shape: f32[1,16,64], index: 7, kind: input, shape index: {}]   ;;  %s1001_s8 = inlined_call_operand.hbm [shape: f32[8,32], index: 8, kind: output, shape index: {}]  }
   0x1   :  { %14 = vsyncpa [#allocation7], 0 }
   0x2   :  { %15 = vsyncpa [#allocation10], 0  ;;  %s33_s29 = sshll.u32 %s994_s1, 4  ;;  %s34_s29 = int_to_ptr.hbm [resolvable:$true] %s33_s29 }
   0x3   :  { %16 = vsyncpa [#allocation5], 0  ;;  %s845_s30 = smov [#allocation6]   ;;  %s60_s12 = sshll.u32 %s998_s5, 4  ;;  %s61_s12 = int_to_ptr.hbm [resolvable:$true] %s60_s12 }
   0x4   :  { %s35_s9 = sshll.u32 %s845_s30, 4  ;;  %s846_s13 = smov [#allocation9]   ;;  %s36_s9 = int_to_ptr.vmem [resolvable:$true] %s35_s9 }
   0x5   :  { %38 = dma.hbm_to_vmem [thread:$0]  %s34_s29, 64, %s36_s9, [#allocation7]  }
   0x6   :  { %s62_s14 = sshll.u32 %s846_s13, 4  ;;  %s22_s17 = sshll.u32 %s993_s0, 4  ;;  %s63_s14 = int_to_ptr.vmem [resolvable:$true] %s62_s14  ;;  %s23_s17 = int_to_ptr.hbm [resolvable:$true] %s22_s17 }
   0x7   :  { %s847_s1 = smov 64   ;;  %s848_s18 = smov 4  }
   0x8   :  { %68 = dma.hbm_to_vmem [thread:$0]  %s61_s12, 256, %s63_s14, [#allocation10], %s847_s1, %s847_s1, %s848_s18  }
   0x9   :  { %s47_s21 = sshll.u32 %s997_s4, 4  ;;  %s849_s22 = smov [#allocation3]   ;;  %s48_s21 = int_to_ptr.hbm [resolvable:$true] %s47_s21 }
   0xa   :  { %s24_s23 = sshll.u32 %s849_s22, 4  ;;  %s850_s5 = smov [#allocation8]   ;;  %s25_s23 = int_to_ptr.vmem [resolvable:$true] %s24_s23 }
   0xb   :  { %27 = dma.hbm_to_vmem [thread:$0]  %s23_s17, 128, %s25_s23, [#allocation4]  }
   0xc   :  { %s49_s24 = sshll.u32 %s850_s5, 4  ;;  %s75_s0 = sshll.u32 %s1000_s7, 4  ;;  %s50_s24 = int_to_ptr.vmem [resolvable:$true] %s49_s24  ;;  %s76_s0 = int_to_ptr.hbm [resolvable:$true] %s75_s0 }
   0xd   :  { %55 = dma.hbm_to_vmem [thread:$0]  %s48_s21, 256, %s50_s24, [#allocation7], %s847_s1, %s847_s1, %s848_s18  }
   0xe   :  { %s851_s27 = smov [#allocation11]   ;;  %s852_s29 = smov 128  }
   0xf   :  { %s77_s28 = sshll.u32 %s851_s27, 4  ;;  %s853_s30 = smov 8   ;;  %s78_s28 = int_to_ptr.vmem [resolvable:$true] %s77_s28 }
  0x10   :  { %83 = dma.hbm_to_vmem [thread:$0]  %s76_s0, 256, %s78_s28, [#allocation10], %s852_s29, %s852_s29, %s853_s30  }
  0x11   :  { %837 = dma.done.wait [#allocation4], 128  }
  0x12   :  { %838 = vsyncadd [#allocation4], 4294967168 }
  0x13   :  { %839 = dma.done.wait [#allocation7], 320  }
  0x14   :  { %840 = vsyncadd [#allocation7], 4294966976 }
  0x15   :  { %841 = dma.done.wait [#allocation10], 512  }
  0x16   :  { %842 = vsyncadd [#allocation10], 4294966784  ;;  %vm120_vm0 = vcmask 1043456   ;;  %v110_v0 = vld [vmem:[#allocation6] sm:$0xf]  ;;  %v109_v1 = vld [vmem:[#allocation3] sm:$0xff]  ;;  %v242_v17 = vlaneseq }
  0x17   :  { %v122_v2 = vsel %vm120_vm0, %v110_v0, 0  ;;  %v111_v3 = vpack.c.bf16 %v109_v1, %v109_v1  ;;  %vm116_vm1 = vcmask 64512   ;;  %v653_v4 = vld [vmem:[%s996_s3 + $0x8] sm:$0xff]  ;;  %v655_v5 = vld [vmem:[%s996_s3 + $0x18] sm:$0xff]  ;;  %v652_v7 = vld [vmem:[%s996_s3] sm:$0xff]  ;;  %vm137_vm2 = vcmask 261120  }
  0x18   :  { %131 = vmatpush.bf16.msra.mxu0 %v122_v2  ;;  %v657_v6 = vld [vmem:[%s996_s3 + $0x28] sm:$0xff]  ;;  %170 = vmatpush.bf16.msra.mxu1 %v653_v4  ;;  %v654_v8 = vld [vmem:[%s996_s3 + $0x10] sm:$0xff]  ;;  %v656_v9 = vld [vmem:[%s996_s3 + $0x20] sm:$0xff]  ;;  %v243_v20 = vand.u32 127, %v242_v17  ;;  %v854_v33 = vmov 0.0   ;;  %vm505_vm11 = vcmask 523264  }
  0x19   :  { %202 = vmatpush.bf16.msra.mxu2 %v655_v5  ;;  %234 = vmatpush.bf16.msra.mxu3 %v657_v6  ;;  %v678_v10 = vld [vmem:[%s995_s2] ss:$0 sm:$0xff]  ;;  %v948_v16 = vld [vmem:[#allocation11] sm:$0xff]  ;;  %s563_s27 = sshll.u32 %s1001_s8, 4  ;;  %s564_s27 = int_to_ptr.hbm [resolvable:$true] %s563_s27 }
  0x1a   :  { %v147_v18 = vperm.slane %v948_v16, 0  ;;  %v183_v22 = vperm.slane %v948_v16, 1  ;;  %v215_v23 = vperm.slane %v948_v16, 2  ;;  %vm290_vm3 = vcmp.ge.s32.totalorder %v243_v20, 16 }
  0x1b   :  { %575 = vmatmul.msk.bf16.vlgmr.msra.gmra.mxu0 %vm116_vm1, %v111_v3  ;;  %vm291_vm4 = vcmp.lt.s32.totalorder %v243_v20, 32  ;;  %vm245_vm5 = vcmp.lt.s32.totalorder %v243_v20, 16 }
  0x1c   :  { %171 = vmatpush.bf16.msra.mxu1 %v652_v7  ;;  %vm292_vm6 = vmand %vm290_vm3, %vm291_vm4  ;;  %v611_v34 = vsel %vm245_vm5, 1.0, %v854_v33 }
  0x1d   :  { %203 = vmatpush.bf16.msra.mxu2 %v654_v8  ;;  %235 = vmatpush.bf16.msra.mxu3 %v656_v9  ;;  %v613_v35 = vsel %vm292_vm6, 1.0, %v854_v33 }
  0x98   :  { %v133_v11 = vpop.f32.mrf.mxu0 }
  0x99   :  { %v134_v12 = vadd.f32 %v678_v10, %v133_v11 }
  0x9b   :  { %138 = vst.msk [vmem:[#allocation2] sm:$0xff] %vm137_vm2, %v134_v12  ;;  %v659_v12 = vld [vmem:[#allocation8 + $0x8] sm:$0xff] }
  0xa0   :  { %v135_v13 = vpop.f32.mrf.mxu0 }
  0xa1   :  { %v658_v13 = vld [vmem:[#allocation8] sm:$0xff] }
  0xa2   :  { %v941_v14 = vld [vmem:[#allocation2] sm:$0xff] }
  0xa3   :  { %v142_v15 = vpack.c.bf16 %v941_v14, %v941_v14 }
  0xa5   :  { %584 = vmatmul.msk.bf16.vlgmr.msra.gmra.mxu1 %vm137_vm2, %v142_v15  ;;  %597 = vmatmul.msk.bf16.vlgmr.msra.gmra.mxu2 %vm137_vm2, %v142_v15 }
  0xa6   :  { %610 = vmatmul.msk.bf16.vlgmr.msra.gmra.mxu3 %vm137_vm2, %v142_v15 }
 0x122   :  { %v173_v19 = vpop.f32.mrf.mxu1 }
 0x123   :  { %v174_v21 = vadd.f32 %v173_v19, %v147_v18 }
 0x125   :  { %v177_v24 = vpack.c.bf16 %v174_v21, %v174_v21 }
 0x127   :  { %v250_v31 = vunpack.c.l.bf16 %v177_v24 }
 0x128   :  { %v205_v25 = vpop.f32.mrf.mxu2 }
 0x129   :  { %v206_v26 = vadd.f32 %v205_v25, %v183_v22  ;;  %v237_v27 = vpop.f32.mrf.mxu3  ;;  %v252_v38 = vmul.f32 %v611_v34, %v250_v31  ;;  %v297_v39 = vmul.f32 %v613_v35, %v250_v31  ;;  %v374_v22 = vperm.slane %v948_v16, 3 }
 0x12a   :  { %v238_v28 = vadd.f32 %v237_v27, %v215_v23  ;;  %v175_v29 = vpop.f32.mrf.mxu1 }
 0x12b   :  { %v209_v30 = vpack.c.bf16 %v206_v26, %v206_v26  ;;  %v253_v46 = vpack.c.bf16 %v252_v38, %v252_v38  ;;  %v298_v47 = vpack.c.bf16 %v297_v39, %v297_v39 }
 0x12c   :  { %v241_v32 = vpack.c.bf16 %v238_v28, %v238_v28  ;;  %v855_v28 = vmov 32.0  }
 0x12d   :  { %v258_v36 = vsel %vm137_vm2, %v209_v30, 0 }
 0x12e   :  { %v287_v37 = vunpack.c.l.bf16 %v241_v32  ;;  %267 = vmatpush.bf16.xpose.msrb.mxu0 %v258_v36  ;;  %309 = vmatpush.bf16.xpose.msrb.mxu1 %v258_v36 }
 0x130   :  { %v207_v40 = vpop.f32.mrf.mxu2  ;;  %v328_v41 = vmul.f32 %v613_v35, %v287_v37  ;;  %v288_v42 = vmul.f32 %v611_v34, %v287_v37 }
 0x131   :  { %v239_v43 = vpop.f32.mrf.mxu3  ;;  %v660_v40 = vld [vmem:[#allocation9] sm:$0xff] }
 0x132   :  { %v329_v44 = vpack.c.bf16 %v328_v41, %v328_v41  ;;  %v289_v45 = vpack.c.bf16 %v288_v42, %v288_v42  ;;  %v665_v41 = vld [vmem:[%s999_s6 + $0x18] sm:$0xff] }
 0x134   :  { %v335_v48 = vsel %vm120_vm0, %v329_v44, 0  ;;  %v354_v49 = vsel %vm120_vm0, %v289_v45, 0  ;;  %v664_v44 = vld [vmem:[%s999_s6 + $0x10] sm:$0xff] }
 0x135   :  { %344 = vmatpush.bf16.msrb.mxu2 %v335_v48  ;;  %363 = vmatpush.bf16.msrb.mxu3 %v354_v49 }
 0x136   :  { %612 = vmatmul.msk.bf16.vlgmr.msrb.gmra.mxu0 %vm137_vm2, %v253_v46  ;;  %614 = vmatmul.msk.bf16.vlgmr.msrb.gmra.mxu1 %vm137_vm2, %v298_v47 }
 0x137   :  { %396 = vmatpush.bf16.msra.mxu0 %v659_v12 }
 0x139   :  { %513 = vmatpush.bf16.msra.mxu2 %v665_v41 }
 0x13b   :  { %397 = vmatpush.bf16.msra.mxu0 %v658_v13 }
 0x13d   :  { %514 = vmatpush.bf16.msra.mxu2 %v664_v44 }
 0x1b3   :  { %v269_v50 = vpop.f32.mrf.mxu0  ;;  %v311_v51 = vpop.f32.mrf.mxu1 }
 0x1b4   :  { %v273_v52 = vmul.f32 0.25, %v269_v50  ;;  %v315_v54 = vmul.f32 0.25, %v311_v51 }
 0x1b6   :  { %v275_v53 = vsel %vm116_vm1, %v273_v52, -inf  ;;  %v316_v57 = vsel %vm116_vm1, %v315_v54, -inf }
 0x1b7   :  { %276 = vmax.xlane.f32.xlu0 %v275_v53 }
 0x1bb   :  { %v271_v55 = vpop.f32.mrf.mxu0  ;;  %v313_v56 = vpop.f32.mrf.mxu1 }
 0x1bf   :  { %317 = vmax.xlane.f32.xlu0 %v316_v57 }
 0x22a   :  { %v277_v58 = vpop.xlane.xlu0 %276 }
 0x22b   :  { %v278_v59 = vsub.f32 %v273_v52, %v277_v58  ;;  %v433_v52 = vperm.slane %v948_v16, 4 }
 0x22d   :  { %v279_v60 = vmul.f32 1.442695, %v278_v59  ;;  %v663_v59 = vld [vmem:[%s999_s6 + $0x8] sm:$0xff] }
 0x22e   :  { %515 = vmatpush.bf16.msra.mxu2 %v663_v59 }
 0x22f   :  { %679 = vpow2.f32 %v279_v60  ;;  %v662_v60 = vld [vmem:[%s999_s6] sm:$0xff]  ;;  %s856_s6 = smov [#allocation12]  }
 0x230   :  { %s561_s25 = sshll.u32 %s856_s6, 4  ;;  %s562_s25 = int_to_ptr.vmem [resolvable:$true] %s561_s25 }
 0x232   :  { %v318_v61 = vpop.xlane.xlu0 %317  ;;  %516 = vmatpush.bf16.msra.mxu2 %v662_v60 }
 0x233   :  { %v319_v62 = vsub.f32 %v315_v54, %v318_v61  ;;  %v435_v54 = vperm.slane %v948_v16, 5  ;;  %v442_v61 = vperm.slane %v948_v16, 6 }
 0x235   :  { %v680_v63 = vpop.eup %679  ;;  %v320_v0 = vmul.f32 1.442695, %v319_v62 }
 0x236   :  { %v281_v1 = vsel %vm116_vm1, %v680_v63, 0.0 }
 0x237   :  { %681 = vpow2.f32 %v320_v0  ;;  %282 = vadd.xlane.f32.xlu1 %v281_v1 }
 0x23d   :  { %v682_v2 = vpop.eup %681 }
 0x23e   :  { %v322_v3 = vsel %vm116_vm1, %v682_v2, 0.0 }
 0x23f   :  { %323 = vadd.xlane.f32.xlu1 %v322_v3  ;;  %v523_v3 = vperm.slane %v948_v16, 7 }
 0x2aa   :  { %v283_v4 = vpop.xlane.xlu1 %282 }
 0x2ab   :  { %683 = vrcp.f32 %v283_v4 }
 0x2b1   :  { %v684_v5 = vpop.eup %683 }
 0x2b2   :  { %v285_v6 = vmul.f32 %v684_v5, %v680_v63  ;;  %v324_v7 = vpop.xlane.xlu1 %323 }
 0x2b3   :  { %685 = vrcp.f32 %v324_v7 }
 0x2b4   :  { %v286_v8 = vpack.c.bf16 %v285_v6, %v285_v6  ;;  %687 = vrcp.f32 %v855_v28 }
 0x2b6   :  { %616 = vmatmul.msk.bf16.vlgmr.msrb.gmra.mxu3 %vm116_vm1, %v286_v8 }
 0x2b9   :  { %v686_v9 = vpop.eup %685 }
 0x2ba   :  { %v326_v10 = vmul.f32 %v686_v9, %v682_v2  ;;  %v688_v29 = vpop.eup %687 }
 0x2bb   :  { %v408_v30 = vmul.f32 32.0, %v688_v29  ;;  %vm412_vm7 = vweird.f32 %v688_v29 }
 0x2bc   :  { %v327_v11 = vpack.c.bf16 %v326_v10, %v326_v10 }
 0x2bd   :  { %v409_v31 = vsub.f32 1.0, %v408_v30 }
 0x2be   :  { %615 = vmatmul.msk.bf16.vlgmr.msrb.gmra.mxu2 %vm116_vm1, %v327_v11 }
 0x2bf   :  { %v410_v32 = vmul.f32 %v688_v29, %v409_v31 }
 0x2c1   :  { %v411_v33 = vadd.f32 %v688_v29, %v410_v32 }
 0x2c3   :  { %v413_v34 = vsel %vm412_vm7, %v688_v29, %v411_v33 }
 0x339   :  { %v365_v15 = vpop.f32.mrf.mxu3 }
 0x341   :  { %v346_v17 = vpop.f32.mrf.mxu2  ;;  %v367_v18 = vpop.f32.mrf.mxu3 }
 0x342   :  { %v366_v19 = vadd.f32 %v365_v15, %v346_v17 }
 0x344   :  { %v373_v20 = vpack.c.bf16 %v366_v19, %v366_v19 }
 0x346   :  { %625 = vmatmul.msk.bf16.vlgmr.msra.gmra.mxu0 %vm137_vm2, %v373_v20 }
 0x349   :  { %v348_v21 = vpop.f32.mrf.mxu2 }
 0x3c3   :  { %v399_v23 = vpop.f32.mrf.mxu0 }
 0x3c4   :  { %v400_v24 = vadd.f32 %v399_v23, %v374_v22  ;;  %v141_v23 = vld [vmem:[#allocation11 + $0x8] sm:$0xff] }
 0x3c5   :  { %v549_v28 = vperm.slane %v141_v23, 1 }
 0x3c6   :  { %v403_v25 = vadd.f32 %v400_v24, %v941_v14  ;;  %v661_v14 = vld [vmem:[#allocation9 + $0x8] sm:$0xff] }
 0x3c7   :  { %464 = vmatpush.bf16.msra.mxu1 %v661_v14 }
 0x3c8   :  { %v404_v26 = vsel %vm137_vm2, %v403_v25, 0.0 }
 0x3c9   :  { %405 = vadd.xlane.f32.xlu2 %v404_v26 }
 0x3cb   :  { %v401_v27 = vpop.f32.mrf.mxu0  ;;  %465 = vmatpush.bf16.msra.mxu1 %v660_v40 }
 0x43c   :  { %v406_v35 = vpop.xlane.xlu2 %405 }
 0x43d   :  { %v414_v36 = vmul.f32 %v413_v34, %v406_v35 }
 0x43f   :  { %v415_v37 = vsub.f32 %v403_v25, %v414_v36  ;;  %v547_v25 = vperm.slane %v141_v23, 0 }
 0x441   :  { %v416_v38 = vmul.f32 %v415_v37, %v415_v37 }
 0x443   :  { %v417_v39 = vsel %vm137_vm2, %v416_v38, 0.0 }
 0x444   :  { %418 = vadd.xlane.f32.xlu2 %v417_v39 }
 0x4b7   :  { %v419_v42 = vpop.xlane.xlu2 %418 }
 0x4b8   :  { %v420_v43 = vmul.f32 %v419_v42, %v413_v34 }
 0x4ba   :  { %v421_v45 = vadd.f32 1e-05, %v420_v43 }
 0x4bc   :  { %689 = vrsqrt.f32 %v421_v45  ;;  %vm428_vm9 = vweird.f32 %v421_v45 }
 0x4c2   :  { %v690_v46 = vpop.eup %689 }
 0x4c3   :  { %v423_v47 = vmul.f32 %v690_v46, %v421_v45  ;;  %vm429_vm8 = vweird.f32 %v690_v46 }
 0x4c4   :  { %vm430_vm10 = vmor %vm428_vm9, %vm429_vm8 }
 0x4c5   :  { %v424_v48 = vmul.f32 %v690_v46, %v423_v47 }
 0x4c7   :  { %v425_v49 = vmul.f32 0.5, %v424_v48 }
 0x4c9   :  { %v426_v50 = vsub.f32 1.5, %v425_v49 }
 0x4cb   :  { %v427_v51 = vmul.f32 %v690_v46, %v426_v50 }
 0x4cd   :  { %v431_v53 = vsel %vm430_vm10, %v690_v46, %v427_v51 }
 0x4ce   :  { %v432_v55 = vmul.f32 %v431_v53, %v415_v37 }
 0x4d0   :  { %v434_v56 = vmul.f32 %v433_v52, %v432_v55 }
 0x4d2   :  { %v436_v57 = vadd.f32 %v435_v54, %v434_v56 }
 0x4d4   :  { %v441_v58 = vpack.c.bf16 %v436_v57, %v436_v57 }
 0x4d6   :  { %634 = vmatmul.msk.bf16.vlgmr.msra.gmra.mxu1 %vm137_vm2, %v441_v58 }
 0x553   :  { %v467_v62 = vpop.f32.mrf.mxu1 }
 0x554   :  { %v468_v63 = vadd.f32 %v467_v62, %v442_v61 }
 0x556   :  { %v471_v0 = vmax.f32 %v468_v63, 0.0 }
 0x558   :  { %v480_v1 = vpack.c.bf16 %v471_v0, %v471_v0 }
 0x55a   :  { %651 = vmatmul.msk.bf16.vlgmr.msra.gmra.mxu2 %vm505_vm11, %v480_v1 }
 0x55b   :  { %v469_v2 = vpop.f32.mrf.mxu1 }
 0x5dd   :  { %v518_v4 = vpop.f32.mrf.mxu2 }
 0x5de   :  { %v522_v5 = vadd.f32 %v518_v4, %v436_v57 }
 0x5e0   :  { %v524_v6 = vadd.f32 %v523_v3, %v522_v5 }
 0x5e2   :  { %v525_v7 = vsel %vm137_vm2, %v524_v6, 0.0 }
 0x5e3   :  { %526 = vadd.xlane.f32.xlu0 %v525_v7 }
 0x5e5   :  { %v520_v8 = vpop.f32.mrf.mxu2 }
 0x656   :  { %v527_v9 = vpop.xlane.xlu0 %526 }
 0x657   :  { %v528_v10 = vmul.f32 %v527_v9, %v413_v34 }
 0x659   :  { %v529_v11 = vsub.f32 %v524_v6, %v528_v10 }
 0x65b   :  { %v530_v12 = vmul.f32 %v529_v11, %v529_v11 }
 0x65d   :  { %v531_v13 = vsel %vm137_vm2, %v530_v12, 0.0 }
 0x65e   :  { %532 = vadd.xlane.f32.xlu1 %v531_v13 }
 0x6d1   :  { %v533_v15 = vpop.xlane.xlu1 %532 }
 0x6d2   :  { %v534_v17 = vmul.f32 %v533_v15, %v413_v34 }
 0x6d4   :  { %v535_v18 = vadd.f32 1e-05, %v534_v17 }
 0x6d6   :  { %691 = vrsqrt.f32 %v535_v18  ;;  %vm542_vm13 = vweird.f32 %v535_v18 }
 0x6dc   :  { %v692_v19 = vpop.eup %691 }
 0x6dd   :  { %v537_v16 = vmul.f32 %v692_v19, %v535_v18  ;;  %vm543_vm12 = vweird.f32 %v692_v19 }
 0x6de   :  { %vm544_vm14 = vmor %vm542_vm13, %vm543_vm12 }
 0x6df   :  { %v538_v20 = vmul.f32 %v692_v19, %v537_v16 }
 0x6e1   :  { %v539_v21 = vmul.f32 0.5, %v538_v20 }
 0x6e3   :  { %v540_v22 = vsub.f32 1.5, %v539_v21 }
 0x6e5   :  { %v541_v24 = vmul.f32 %v692_v19, %v540_v22 }
 0x6e7   :  { %v545_v26 = vsel %vm544_vm14, %v692_v19, %v541_v24 }
 0x6e8   :  { %v546_v27 = vmul.f32 %v545_v26, %v529_v11 }
 0x6ea   :  { %v548_v29 = vmul.f32 %v547_v25, %v546_v27 }
 0x6ec   :  { %v550_v30 = vadd.f32 %v549_v28, %v548_v29 }
 0x6ee   :  { %551 = vst.msk [vmem:[#allocation2] sm:$0xff] %vm137_vm2, %v550_v30 }
 0x6ef   :  { %555 = vst.msk [vmem:[#allocation12] sm:$0xff] %vm137_vm2, %v550_v30 }
 0x6f0   :  { %566 = dma.vmem_to_hbm [thread:$0]  %s562_s25, 128, %s564_s27, [#allocation5]  }
 0x6f1   :  { %843 = dma.done.wait [#allocation5], 128  }
 0x6f2   :  { %844 = vsyncadd [#allocation5], 4294967168 }
 0x6f3   :  { %571 = vsyncpa [#allocation4], 1 }
 0x6f4   :  { %572 = vsyncpa [#allocation7], 1 }
 0x6f5   :  { %573 = vsyncpa [#allocation10], 1 }
 0x6f6   :  { %574 = vsyncpa [#allocation5], 1 }

</bundles_post_ra>
